<compile_context>
chip_gen: v5e
topology: v5e:2x2
jax: 0.10.0
libtpu: 0.0.40
codegen_flags: <defaults>
</compile_context>

<pallas_src>
import jax
import jax.numpy as jnp
from jax.experimental import pallas as pl
from jax.experimental.pallas import tpu as pltpu

EPS = 1e-5
NEG_SLOPE = 0.2


def _leaky(x):
    return jnp.where(x > 0, x, NEG_SLOPE * x)


def _masked_instance_norm(y, mask, inv_count):
    """One-pass InstanceNorm over the valid lanes of y.

    y: (F, Rout) float32, mask: (1, Rout) float32 in {0,1} with Hp*Wp ones.
    """
    ym = y * mask
    s1 = jnp.sum(ym, axis=1, keepdims=True)          # sum(y)   over valid lanes
    s2 = jnp.sum(ym * y, axis=1, keepdims=True)      # sum(y^2) over valid lanes
    mu = s1 * inv_count
    var = jnp.maximum(s2 * inv_count - mu * mu, 0.0)
    return (y - mu) * jax.lax.rsqrt(var + EPS)


def _geometry(Hp, Wp):
    Pp = ((Wp + 2 + 7) // 8) * 8                     # padded row width (mult of 8)
    Rout = Hp * Pp                                   # flattened padded spatial size
    base = ((Pp + 1 + 127) // 128) * 128             # 128-aligned start of skip block
    Cpad = ((base + Rout + Pp + 1 + 127) // 128) * 128
    return Pp, Rout, base, Cpad


def _make_down_block_kernel(Hp, Wp, F, Fs, cdt):
    Pp, Rout, base, Cpad = _geometry(Hp, Wp)
    inv_count = 1.0 / float(Hp * Wp)                 # valid spatial positions

    def kernel(x4_ref, w1_ref, b1_ref, w3_ref, b3_ref, out_ref, pad_ref, patch_ref):
        # --- zero ONLY the padding ring / slack columns of the skip scratch ----
        # (every step: with "parallel" semantics each TensorCore has its own
        #  scratch, so this must not be gated on program_id == 0).
        pad_ref[:, 0:base] = jnp.zeros((F, base), cdt)
        pad_ref[:, base + Rout:Cpad] = jnp.zeros((F, Cpad - base - Rout), cdt)

        # --- in-kernel validity mask over flattened padded-width lanes ---------
        # col = idx mod Pp, computed with float floor-division; the +0.5 guard
        # keeps floor() exact even if the divide lowers to an approx reciprocal.
        idx = jax.lax.broadcasted_iota(jnp.int32, (1, Rout), 1).astype(jnp.float32)
        row = jnp.floor((idx + 0.5) * (1.0 / float(Pp)))
        col = idx - float(Pp) * row
        mask = (col < float(Wp)).astype(jnp.float32)           # (1, Rout)

        # ---- stage 1: MaxPool2d(2) -> 1x1 conv -> InstanceNorm -> LeakyReLU ----
        pooled = jnp.max(x4_ref[0], axis=0)                    # (Cin, Rout) 2x2 max
        s = jnp.dot(w1_ref[...], pooled,                       # 1x1 conv == matmul
                    preferred_element_type=jnp.float32)        # (F, Rout) f32
        s = s + b1_ref[...]
        s = _masked_instance_norm(s, mask, inv_count)
        s = _leaky(s) * mask                                   # zero the pad lanes
        # 128-aligned lane store of the skip tile into the padded scratch.
        pad_ref[:, base:base + Rout] = s.astype(cdt)

        # ---- stage 2: 3x3 conv as ONE K=9F patch matmul -> IN -> +skip -> LeakyReLU
        for t in range(9):
            ky, kx = divmod(t, 3)
            off = base + (ky - 1) * Pp + (kx - 1)              # static tap offset
            patch_ref[t * Fs:t * Fs + F, :] = pad_ref[:, off:off + Rout]
        if Fs != F:   # keep padded K-rows zero so stale VMEM can't pollute the dot
            for t in range(9):
                patch_ref[t * Fs + F:(t + 1) * Fs, :] = jnp.zeros((Fs - F, Rout), cdt)

        z = jnp.dot(w3_ref[...], patch_ref[...],               # (F,9Fs)@(9Fs,Rout)
                    preferred_element_type=jnp.float32)
        z = z + b3_ref[...]
        z = _masked_instance_norm(z, mask, inv_count)
        # Residual uses the live f32 `s` (not a bf16 re-read of pad_ref).
        out_ref[0] = _leaky(z + s).astype(out_ref.dtype)       # lane-dense store

    return kernel


def _tile_bytes(shape, dtype):
    dt = jnp.dtype(dtype)
    sub_tile = 8 * max(1, 4 // dt.itemsize)          # f32: 8, bf16: 16, int8: 32
    *lead, s, l = shape
    n = 1
    for d in lead:
        n *= d
    return n * (-(-s // sub_tile) * sub_tile) * (-(-l // 128) * 128) * dt.itemsize


def _vmem_limit_bytes(need):
    try:
        kind = jax.devices()[0].device_kind.lower()
    except Exception:
        kind = ""
    if any(t in kind for t in ("v2", "v3", "v4", "v5", "v6")):
        cap = 100 << 20          # 128 MiB physical on these generations
    else:
        cap = 56 << 20           # v7x: 64 MiB / TC, leave Mosaic scratch headroom
    return int(min(max(need, 16 << 20), cap))


def down_block_forward(x_nchw, w1, b1, w3, b3, *, compute_dtype=jnp.bfloat16):
    """x_nchw: (N, Cin, H, W); conv weights in PyTorch layout.
    Returns (N, F, H//2, W//2), matching DownBlock.forward."""
    N, Cin, H, W = x_nchw.shape
    F = w1.shape[0]
    assert H % 2 == 0 and W % 2 == 0, "MaxPool2d(2) path expects even H, W"
    Hp, Wp = H // 2, W // 2
    Pp, Rout, base, Cpad = _geometry(Hp, Wp)
    Fs = -(-F // 8) * 8
    cdt = jnp.dtype(compute_dtype)

    # --- glue: 2x2-window candidates, channels-in-sublanes / spatial-in-lanes ---
    # TODO(synk): fuse this candidate build into the upstream producer (or pool
    # from an NHWC block in-kernel) to cut the extra input HBM round trip.
    x4 = (x_nchw.reshape(N, Cin, Hp, 2, Wp, 2)
                .transpose(0, 3, 5, 1, 2, 4))                  # (N,2,2,Cin,Hp,Wp)
    x4 = jnp.pad(x4, ((0, 0),) * 5 + ((0, Pp - Wp),))          # Wp -> Pp (zeros)
    x4p = x4.reshape(N, 4, Cin, Rout).astype(cdt)

    # --- glue: parameters into matmul layouts -----------------------------------
    w1_mat = w1[:, :, 0, 0].astype(cdt)                        # (F, Cin)
    b1_mat = b1.reshape(F, 1).astype(jnp.float32)
    w3_t = jnp.transpose(w3, (0, 2, 3, 1))                     # (Fout, ky, kx, Fin)
    if Fs != F:
        w3_t = jnp.pad(w3_t, ((0, 0), (0, 0), (0, 0), (0, Fs - F)))
    w3_mat = w3_t.reshape(F, 9 * Fs).astype(cdt)               # (F, 9*Fs) tap-major
    b3_mat = b3.reshape(F, 1).astype(jnp.float32)

    kernel = _make_down_block_kernel(Hp, Wp, F, Fs, cdt)

    # --- VMEM budget: double-buffered blocks + params + scratch + headroom ------
    need = (2 * (_tile_bytes((1, 4, Cin, Rout), cdt)
                 + _tile_bytes((1, F, Rout), jnp.float32))
            + 2 * (_tile_bytes((F, Cin), cdt)
                   + _tile_bytes((F, 9 * Fs), cdt)
                   + 2 * _tile_bytes((F, 1), jnp.float32))
            + _tile_bytes((F, Cpad), cdt)
            + _tile_bytes((9 * Fs, Rout), cdt)
            + (8 << 20))
    vmem_limit = _vmem_limit_bytes(need)
    # TODO(synk): very large Hp*Wp needs a spatial-tiling grid axis with two-pass
    # InstanceNorm statistics instead of a single full-image block (esp. on v7x).
    # TODO(synk): for large N, fold several images per grid step (reshape the
    # stats reduction per image) to amortize per-step overhead.

    out_flat = pl.pallas_call(
        kernel,
        out_shape=jax.ShapeDtypeStruct((N, F, Rout), jnp.float32),
        grid=(N,),
        in_specs=[
            pl.BlockSpec((1, 4, Cin, Rout), lambda n: (n, 0, 0, 0)),  # pool candidates
            pl.BlockSpec((F, Cin), lambda n: (0, 0)),                 # w1
            pl.BlockSpec((F, 1), lambda n: (0, 0)),                   # b1
            pl.BlockSpec((F, 9 * Fs), lambda n: (0, 0)),              # w3 (tap-major)
            pl.BlockSpec((F, 1), lambda n: (0, 0)),                   # b3
        ],
        out_specs=pl.BlockSpec((1, F, Rout), lambda n: (n, 0, 0)),
        scratch_shapes=[pltpu.VMEM((F, Cpad), cdt),                   # padded skip buffer
                        pltpu.VMEM((9 * Fs, Rout), cdt)],             # K=9F patch matrix
        compiler_params=pltpu.CompilerParams(
            dimension_semantics=("parallel",),                        # batch over TCs
            vmem_limit_bytes=vmem_limit),
    )(x4p, w1_mat, b1_mat, w3_mat, b3_mat)

    # Already channel-major: just drop the pad columns (no transpose needed).
    return out_flat.reshape(N, F, Hp, Pp)[:, :, :, :Wp]


# ------------------------------------------------------------------------------
# Pure-JAX reference (mirrors the PyTorch forward exactly), for verification.
# ------------------------------------------------------------------------------
def down_block_reference(x, w1, b1, w3, b3):
    N, C, H, W = x.shape
    Hp, Wp = H // 2, W // 2

    def inorm(t):
        mu = t.mean(axis=(2, 3), keepdims=True)
        var = ((t - mu) ** 2).mean(axis=(2, 3), keepdims=True)
        return (t - mu) / jnp.sqrt(var + EPS)

    xp = x.reshape(N, C, Hp, 2, Wp, 2).max(axis=(3, 5))
    y = jnp.einsum('nchw,fc->nfhw', xp, w1[:, :, 0, 0]) + b1[None, :, None, None]
    y = inorm(y)
    y = jnp.where(y > 0, y, NEG_SLOPE * y)

    yp = jnp.pad(y, ((0, 0), (0, 0), (1, 1), (1, 1)))
    z = jnp.zeros_like(y) + b3[None, :, None, None]
    for ky in range(3):
        for kx in range(3):
            z = z + jnp.einsum('nchw,fc->nfhw',
                               yp[:, :, ky:ky + Hp, kx:kx + Wp], w3[:, :, ky, kx])
    z = inorm(z)
    s = z + y
    return jnp.where(s > 0, s, NEG_SLOPE * s)


if __name__ == "__main__":
    # Small, deterministic setup: batch=2, in_channels=4, features_dim=8, spatial=16.
    N, Cin, H, W = 2, 4, 16, 16
    F = 8

    key = jax.random.PRNGKey(0)
    kx_, k1, k2, k3, k4 = jax.random.split(key, 5)

    x = jax.random.normal(kx_, (N, Cin, H, W), dtype=jnp.float32)
    # Conv2d(in_channels, features_dim, 1) params
    w1 = 0.2 * jax.random.normal(k1, (F, Cin, 1, 1), dtype=jnp.float32)
    b1 = 0.1 * jax.random.normal(k2, (F,), dtype=jnp.float32)
    # Conv2d(features_dim, features_dim, 3, padding=1) params
    w3 = 0.1 * jax.random.normal(k3, (F, F, 3, 3), dtype=jnp.float32)
    b3 = 0.1 * jax.random.normal(k4, (F,), dtype=jnp.float32)

    ref = down_block_reference(x, w1, b1, w3, b3)

    # Float32 operand path: tight check against the f32 reference.
    out_f32 = jax.block_until_ready(
        down_block_forward(x, w1, b1, w3, b3, compute_dtype=jnp.float32))
    assert out_f32.shape == (N, F, H // 2, W // 2), out_f32.shape
    if not jnp.allclose(out_f32, ref, rtol=1e-4, atol=1e-4):
        raise AssertionError("Pallas DownBlock (f32) output mismatch vs reference")

    # Default bf16 matmul-operand path (f32 accumulation): mixed-precision tolerance.
    out_bf16 = jax.block_until_ready(down_block_forward(x, w1, b1, w3, b3))
    assert out_bf16.shape == (N, F, H // 2, W // 2), out_bf16.shape
    if not jnp.allclose(out_bf16, ref, rtol=5e-2, atol=5e-2):
        raise AssertionError("Pallas DownBlock (bf16) output mismatch vs reference")

    print("KERNEL_OK")
</pallas_src>

<mosaic_0001>
module attributes {stable_mosaic.version = 11 : i64} {
  func.func @kernel(%arg0: i32, %arg1: memref<1x4x4x128xf32, #tpu.memory_space<vmem>>, %arg2: memref<8x4xf32, #tpu.memory_space<vmem>>, %arg3: memref<8x1xf32, #tpu.memory_space<vmem>>, %arg4: memref<8x72xf32, #tpu.memory_space<vmem>>, %arg5: memref<8x1xf32, #tpu.memory_space<vmem>>, %arg6: memref<1x8x128xf32, #tpu.memory_space<vmem>>, %arg7: memref<8x384xf32, #tpu.memory_space<vmem>>, %arg8: memref<72x128xf32, #tpu.memory_space<vmem>>) attributes {dimension_semantics = [#tpu.dimension_semantics<parallel>], iteration_bounds = array<i64: 2>, scalar_prefetch = 0 : i64, scratch_operands = 2 : i64, tpu.core_type = #tpu.core_type<tc>, window_params = [{transform_indices = @transform_0, window_bounds = array<i64: 1, 4, 4, 128>}, {pipeline_mode = #tpu.pipeline_mode<synchronous>, transform_indices = @transform_1, window_bounds = array<i64: 8, 4>}, {pipeline_mode = #tpu.pipeline_mode<synchronous>, transform_indices = @transform_2, window_bounds = array<i64: 8, 1>}, {pipeline_mode = #tpu.pipeline_mode<synchronous>, transform_indices = @transform_3, window_bounds = array<i64: 8, 72>}, {pipeline_mode = #tpu.pipeline_mode<synchronous>, transform_indices = @transform_4, window_bounds = array<i64: 8, 1>}, {transform_indices = @transform_5, window_bounds = array<i64: 1, 8, 128>}]} {
    %cst = arith.constant 0.000000e+00 : f32
    %0 = vector.broadcast %cst : f32 to vector<8x128xf32>
    %c0 = arith.constant 0 : index
    %c0_0 = arith.constant 0 : index
    %1 = vector.load %arg7[%c0, %c0_0] : memref<8x384xf32, #tpu.memory_space<vmem>>, vector<8x128xf32>
    tpu.vector_store %arg7[%c0, %c0_0], %0 {strides = array<i32>} : memref<8x384xf32, #tpu.memory_space<vmem>>, vector<8x128xf32>,
    %cst_1 = arith.constant 0.000000e+00 : f32
    %2 = vector.broadcast %cst_1 : f32 to vector<8x128xf32>
    %c0_2 = arith.constant 0 : index
    %c256 = arith.constant 256 : index
    %3 = vector.load %arg7[%c0_2, %c256] : memref<8x384xf32, #tpu.memory_space<vmem>>, vector<8x128xf32>
    tpu.vector_store %arg7[%c0_2, %c256], %2 {strides = array<i32>} : memref<8x384xf32, #tpu.memory_space<vmem>>, vector<8x128xf32>,
    %4 = tpu.iota {dimensions = array<i32: 1>} : vector<1x128xi32>
    %5 = arith.sitofp %4 : vector<1x128xi32> to vector<1x128xf32>
    %cst_3 = arith.constant 5.000000e-01 : f32
    %6 = vector.broadcast %cst_3 : f32 to vector<1x128xf32>
    %7 = arith.addf %5, %6 : vector<1x128xf32>
    %cst_4 = arith.constant 6.250000e-02 : f32
    %8 = vector.broadcast %cst_4 : f32 to vector<1x128xf32>
    %9 = arith.mulf %7, %8 : vector<1x128xf32>
    %10 = math.floor %9 : vector<1x128xf32>
    %cst_5 = arith.constant 1.600000e+01 : f32
    %11 = vector.broadcast %cst_5 : f32 to vector<1x128xf32>
    %12 = arith.mulf %11, %10 : vector<1x128xf32>
    %13 = arith.subf %5, %12 : vector<1x128xf32>
    %cst_6 = arith.constant 8.000000e+00 : f32
    %14 = vector.broadcast %cst_6 : f32 to vector<1x128xf32>
    %15 = arith.cmpf olt, %13, %14 : vector<1x128xf32>
    %16 = arith.extui %15 : vector<1x128xi1> to vector<1x128xi32>
    %17 = arith.sitofp %16 : vector<1x128xi32> to vector<1x128xf32>
    %c0_7 = arith.constant 0 : index
    %c0_8 = arith.constant 0 : index
    %c0_9 = arith.constant 0 : index
    %c0_10 = arith.constant 0 : index
    %18 = vector.load %arg1[%c0_7, %c0_8, %c0_9, %c0_10] : memref<1x4x4x128xf32, #tpu.memory_space<vmem>>, vector<1x4x4x128xf32>
    %19 = vector.shape_cast %18 : vector<1x4x4x128xf32> to vector<4x4x128xf32>
    %cst_11 = arith.constant dense<0xFF800000> : vector<4x128xf32>
    %20 = vector.multi_reduction <maximumf>, %19, %cst_11 [0] : vector<4x4x128xf32> to vector<4x128xf32>
    %c0_12 = arith.constant 0 : index
    %c0_13 = arith.constant 0 : index
    %21 = vector.load %arg2[%c0_12, %c0_13] : memref<8x4xf32, #tpu.memory_space<vmem>>, vector<8x4xf32>
    %cst_14 = arith.constant dense<0.000000e+00> : vector<8x128xf32>
    %22 = tpu.matmul %21, %20, %cst_14 {dimension_numbers = #tpu.dot_dimension_numbers<[1], [0], [0], [1], [0, 0, 1, 1], [], []>} : vector<8x4xf32>, vector<4x128xf32>, vector<8x128xf32> -> vector<8x128xf32>
    %c0_15 = arith.constant 0 : index
    %c0_16 = arith.constant 0 : index
    %23 = vector.load %arg3[%c0_15, %c0_16] : memref<8x1xf32, #tpu.memory_space<vmem>>, vector<8x1xf32>
    %24 = vector.broadcast %23 : vector<8x1xf32> to vector<8x128xf32>
    %25 = arith.addf %22, %24 : vector<8x128xf32>
    %26 = vector.broadcast %17 : vector<1x128xf32> to vector<8x128xf32>
    %27 = arith.mulf %25, %26 : vector<8x128xf32>
    %cst_17 = arith.constant dense<0.000000e+00> : vector<8xf32>
    %28 = vector.multi_reduction <add>, %27, %cst_17 [1] : vector<8x128xf32> to vector<8xf32>
    %29 = vector.shape_cast %28 : vector<8xf32> to vector<8x1xf32>
    %30 = arith.mulf %27, %25 : vector<8x128xf32>
    %cst_18 = arith.constant dense<0.000000e+00> : vector<8xf32>
    %31 = vector.multi_reduction <add>, %30, %cst_18 [1] : vector<8x128xf32> to vector<8xf32>
    %32 = vector.shape_cast %31 : vector<8xf32> to vector<8x1xf32>
    %cst_19 = arith.constant 1.562500e-02 : f32
    %33 = vector.broadcast %cst_19 : f32 to vector<8x1xf32>
    %34 = arith.mulf %29, %33 : vector<8x1xf32>
    %cst_20 = arith.constant 1.562500e-02 : f32
    %35 = vector.broadcast %cst_20 : f32 to vector<8x1xf32>
    %36 = arith.mulf %32, %35 : vector<8x1xf32>
    %37 = arith.mulf %34, %34 : vector<8x1xf32>
    %38 = arith.subf %36, %37 : vector<8x1xf32>
    %cst_21 = arith.constant 0.000000e+00 : f32
    %39 = vector.broadcast %cst_21 : f32 to vector<8x1xf32>
    %40 = arith.maximumf %38, %39 : vector<8x1xf32>
    %41 = vector.broadcast %34 : vector<8x1xf32> to vector<8x128xf32>
    %42 = arith.subf %25, %41 : vector<8x128xf32>
    %cst_22 = arith.constant 9.99999974E-6 : f32
    %43 = vector.broadcast %cst_22 : f32 to vector<8x1xf32>
    %44 = arith.addf %40, %43 : vector<8x1xf32>
    %45 = math.rsqrt %44 : vector<8x1xf32>
    %46 = vector.broadcast %45 : vector<8x1xf32> to vector<8x128xf32>
    %47 = arith.mulf %42, %46 : vector<8x128xf32>
    %cst_23 = arith.constant 0.000000e+00 : f32
    %48 = vector.broadcast %cst_23 : f32 to vector<8x128xf32>
    %49 = arith.cmpf ogt, %47, %48 : vector<8x128xf32>
    %cst_24 = arith.constant 2.000000e-01 : f32
    %50 = vector.broadcast %cst_24 : f32 to vector<8x128xf32>
    %51 = arith.mulf %50, %47 : vector<8x128xf32>
    %52 = arith.select %49, %47, %51 : vector<8x128xi1>, vector<8x128xf32>
    %53 = vector.broadcast %17 : vector<1x128xf32> to vector<8x128xf32>
    %54 = arith.mulf %52, %53 : vector<8x128xf32>
    %c0_25 = arith.constant 0 : index
    %c128 = arith.constant 128 : index
    %55 = vector.load %arg7[%c0_25, %c128] : memref<8x384xf32, #tpu.memory_space<vmem>>, vector<8x128xf32>
    tpu.vector_store %arg7[%c0_25, %c128], %54 {strides = array<i32>} : memref<8x384xf32, #tpu.memory_space<vmem>>, vector<8x128xf32>,
    %c0_26 = arith.constant 0 : index
    %c111 = arith.constant 111 : index
    %56 = vector.load %arg7[%c0_26, %c111] : memref<8x384xf32, #tpu.memory_space<vmem>>, vector<8x128xf32>
    %c0_27 = arith.constant 0 : index
    %c0_28 = arith.constant 0 : index
    %57 = vector.load %arg8[%c0_27, %c0_28] : memref<72x128xf32, #tpu.memory_space<vmem>>, vector<8x128xf32>
    tpu.vector_store %arg8[%c0_27, %c0_28], %56 {strides = array<i32>} : memref<72x128xf32, #tpu.memory_space<vmem>>, vector<8x128xf32>,
    %c0_29 = arith.constant 0 : index
    %c112 = arith.constant 112 : index
    %58 = vector.load %arg7[%c0_29, %c112] : memref<8x384xf32, #tpu.memory_space<vmem>>, vector<8x128xf32>
    %c8 = arith.constant 8 : index
    %c0_30 = arith.constant 0 : index
    %59 = vector.load %arg8[%c8, %c0_30] : memref<72x128xf32, #tpu.memory_space<vmem>>, vector<8x128xf32>
    tpu.vector_store %arg8[%c8, %c0_30], %58 {strides = array<i32>} : memref<72x128xf32, #tpu.memory_space<vmem>>, vector<8x128xf32>,
    %c0_31 = arith.constant 0 : index
    %c113 = arith.constant 113 : index
    %60 = vector.load %arg7[%c0_31, %c113] : memref<8x384xf32, #tpu.memory_space<vmem>>, vector<8x128xf32>
    %c16 = arith.constant 16 : index
    %c0_32 = arith.constant 0 : index
    %61 = vector.load %arg8[%c16, %c0_32] : memref<72x128xf32, #tpu.memory_space<vmem>>, vector<8x128xf32>
    tpu.vector_store %arg8[%c16, %c0_32], %60 {strides = array<i32>} : memref<72x128xf32, #tpu.memory_space<vmem>>, vector<8x128xf32>,
    %c0_33 = arith.constant 0 : index
    %c127 = arith.constant 127 : index
    %62 = vector.load %arg7[%c0_33, %c127] : memref<8x384xf32, #tpu.memory_space<vmem>>, vector<8x128xf32>
    %c24 = arith.constant 24 : index
    %c0_34 = arith.constant 0 : index
    %63 = vector.load %arg8[%c24, %c0_34] : memref<72x128xf32, #tpu.memory_space<vmem>>, vector<8x128xf32>
    tpu.vector_store %arg8[%c24, %c0_34], %62 {strides = array<i32>} : memref<72x128xf32, #tpu.memory_space<vmem>>, vector<8x128xf32>,
    %c0_35 = arith.constant 0 : index
    %c128_36 = arith.constant 128 : index
    %64 = vector.load %arg7[%c0_35, %c128_36] : memref<8x384xf32, #tpu.memory_space<vmem>>, vector<8x128xf32>
    %c32 = arith.constant 32 : index
    %c0_37 = arith.constant 0 : index
    %65 = vector.load %arg8[%c32, %c0_37] : memref<72x128xf32, #tpu.memory_space<vmem>>, vector<8x128xf32>
    tpu.vector_store %arg8[%c32, %c0_37], %64 {strides = array<i32>} : memref<72x128xf32, #tpu.memory_space<vmem>>, vector<8x128xf32>,
    %c0_38 = arith.constant 0 : index
    %c129 = arith.constant 129 : index
    %66 = vector.load %arg7[%c0_38, %c129] : memref<8x384xf32, #tpu.memory_space<vmem>>, vector<8x128xf32>
    %c40 = arith.constant 40 : index
    %c0_39 = arith.constant 0 : index
    %67 = vector.load %arg8[%c40, %c0_39] : memref<72x128xf32, #tpu.memory_space<vmem>>, vector<8x128xf32>
    tpu.vector_store %arg8[%c40, %c0_39], %66 {strides = array<i32>} : memref<72x128xf32, #tpu.memory_space<vmem>>, vector<8x128xf32>,
    %c0_40 = arith.constant 0 : index
    %c143 = arith.constant 143 : index
    %68 = vector.load %arg7[%c0_40, %c143] : memref<8x384xf32, #tpu.memory_space<vmem>>, vector<8x128xf32>
    %c48 = arith.constant 48 : index
    %c0_41 = arith.constant 0 : index
    %69 = vector.load %arg8[%c48, %c0_41] : memref<72x128xf32, #tpu.memory_space<vmem>>, vector<8x128xf32>
    tpu.vector_store %arg8[%c48, %c0_41], %68 {strides = array<i32>} : memref<72x128xf32, #tpu.memory_space<vmem>>, vector<8x128xf32>,
    %c0_42 = arith.constant 0 : index
    %c144 = arith.constant 144 : index
    %70 = vector.load %arg7[%c0_42, %c144] : memref<8x384xf32, #tpu.memory_space<vmem>>, vector<8x128xf32>
    %c56 = arith.constant 56 : index
    %c0_43 = arith.constant 0 : index
    %71 = vector.load %arg8[%c56, %c0_43] : memref<72x128xf32, #tpu.memory_space<vmem>>, vector<8x128xf32>
    tpu.vector_store %arg8[%c56, %c0_43], %70 {strides = array<i32>} : memref<72x128xf32, #tpu.memory_space<vmem>>, vector<8x128xf32>,
    %c0_44 = arith.constant 0 : index
    %c145 = arith.constant 145 : index
    %72 = vector.load %arg7[%c0_44, %c145] : memref<8x384xf32, #tpu.memory_space<vmem>>, vector<8x128xf32>
    %c64 = arith.constant 64 : index
    %c0_45 = arith.constant 0 : index
    %73 = vector.load %arg8[%c64, %c0_45] : memref<72x128xf32, #tpu.memory_space<vmem>>, vector<8x128xf32>
    tpu.vector_store %arg8[%c64, %c0_45], %72 {strides = array<i32>} : memref<72x128xf32, #tpu.memory_space<vmem>>, vector<8x128xf32>,
    %c0_46 = arith.constant 0 : index
    %c0_47 = arith.constant 0 : index
    %74 = vector.load %arg4[%c0_46, %c0_47] : memref<8x72xf32, #tpu.memory_space<vmem>>, vector<8x72xf32>
    %c0_48 = arith.constant 0 : index
    %c0_49 = arith.constant 0 : index
    %75 = vector.load %arg8[%c0_48, %c0_49] : memref<72x128xf32, #tpu.memory_space<vmem>>, vector<72x128xf32>
    %cst_50 = arith.constant dense<0.000000e+00> : vector<8x128xf32>
    %76 = tpu.matmul %74, %75, %cst_50 {dimension_numbers = #tpu.dot_dimension_numbers<[1], [0], [0], [1], [0, 0, 1, 1], [], []>} : vector<8x72xf32>, vector<72x128xf32>, vector<8x128xf32> -> vector<8x128xf32>
    %c0_51 = arith.constant 0 : index
    %c0_52 = arith.constant 0 : index
    %77 = vector.load %arg5[%c0_51, %c0_52] : memref<8x1xf32, #tpu.memory_space<vmem>>, vector<8x1xf32>
    %78 = vector.broadcast %77 : vector<8x1xf32> to vector<8x128xf32>
    %79 = arith.addf %76, %78 : vector<8x128xf32>
    %80 = vector.broadcast %17 : vector<1x128xf32> to vector<8x128xf32>
    %81 = arith.mulf %79, %80 : vector<8x128xf32>
    %cst_53 = arith.constant dense<0.000000e+00> : vector<8xf32>
    %82 = vector.multi_reduction <add>, %81, %cst_53 [1] : vector<8x128xf32> to vector<8xf32>
    %83 = vector.shape_cast %82 : vector<8xf32> to vector<8x1xf32>
    %84 = arith.mulf %81, %79 : vector<8x128xf32>
    %cst_54 = arith.constant dense<0.000000e+00> : vector<8xf32>
    %85 = vector.multi_reduction <add>, %84, %cst_54 [1] : vector<8x128xf32> to vector<8xf32>
    %86 = vector.shape_cast %85 : vector<8xf32> to vector<8x1xf32>
    %cst_55 = arith.constant 1.562500e-02 : f32
    %87 = vector.broadcast %cst_55 : f32 to vector<8x1xf32>
    %88 = arith.mulf %83, %87 : vector<8x1xf32>
    %cst_56 = arith.constant 1.562500e-02 : f32
    %89 = vector.broadcast %cst_56 : f32 to vector<8x1xf32>
    %90 = arith.mulf %86, %89 : vector<8x1xf32>
    %91 = arith.mulf %88, %88 : vector<8x1xf32>
    %92 = arith.subf %90, %91 : vector<8x1xf32>
    %cst_57 = arith.constant 0.000000e+00 : f32
    %93 = vector.broadcast %cst_57 : f32 to vector<8x1xf32>
    %94 = arith.maximumf %92, %93 : vector<8x1xf32>
    %95 = vector.broadcast %88 : vector<8x1xf32> to vector<8x128xf32>
    %96 = arith.subf %79, %95 : vector<8x128xf32>
    %cst_58 = arith.constant 9.99999974E-6 : f32
    %97 = vector.broadcast %cst_58 : f32 to vector<8x1xf32>
    %98 = arith.addf %94, %97 : vector<8x1xf32>
    %99 = math.rsqrt %98 : vector<8x1xf32>
    %100 = vector.broadcast %99 : vector<8x1xf32> to vector<8x128xf32>
    %101 = arith.mulf %96, %100 : vector<8x128xf32>
    %102 = arith.addf %101, %54 : vector<8x128xf32>
    %cst_59 = arith.constant 0.000000e+00 : f32
    %103 = vector.broadcast %cst_59 : f32 to vector<8x128xf32>
    %104 = arith.cmpf ogt, %102, %103 : vector<8x128xf32>
    %cst_60 = arith.constant 2.000000e-01 : f32
    %105 = vector.broadcast %cst_60 : f32 to vector<8x128xf32>
    %106 = arith.mulf %105, %102 : vector<8x128xf32>
    %107 = arith.select %104, %102, %106 : vector<8x128xi1>, vector<8x128xf32>
    %c0_61 = arith.constant 0 : index
    %c0_62 = arith.constant 0 : index
    %c0_63 = arith.constant 0 : index
    %108 = vector.load %arg6[%c0_61, %c0_62, %c0_63] : memref<1x8x128xf32, #tpu.memory_space<vmem>>, vector<1x8x128xf32>
    %109 = vector.shape_cast %108 : vector<1x8x128xf32> to vector<8x128xf32>
    %110 = vector.shape_cast %107 : vector<8x128xf32> to vector<1x8x128xf32>
    tpu.vector_store %arg6[%c0_61, %c0_62, %c0_63], %110 {strides = array<i32>} : memref<1x8x128xf32, #tpu.memory_space<vmem>>, vector<1x8x128xf32>,
    return
  }
  func.func @transform_0(%arg0: i32) -> (i32, i32, i32, i32) {
    %c0_i32 = arith.constant 0 : i32
    %c0_i32_0 = arith.constant 0 : i32
    %c0_i32_1 = arith.constant 0 : i32
    %c0_i32_2 = arith.constant 0 : i32
    return %arg0, %c0_i32, %c0_i32_0, %c0_i32_1 : i32, i32, i32, i32
  }
  func.func @transform_1(%arg0: i32) -> (i32, i32) {
    %c0_i32 = arith.constant 0 : i32
    %c0_i32_0 = arith.constant 0 : i32
    %c0_i32_1 = arith.constant 0 : i32
    return %c0_i32, %c0_i32_0 : i32, i32
  }
  func.func @transform_2(%arg0: i32) -> (i32, i32) {
    %c0_i32 = arith.constant 0 : i32
    %c0_i32_0 = arith.constant 0 : i32
    %c0_i32_1 = arith.constant 0 : i32
    return %c0_i32, %c0_i32_0 : i32, i32
  }
  func.func @transform_3(%arg0: i32) -> (i32, i32) {
    %c0_i32 = arith.constant 0 : i32
    %c0_i32_0 = arith.constant 0 : i32
    %c0_i32_1 = arith.constant 0 : i32
    return %c0_i32, %c0_i32_0 : i32, i32
  }
  func.func @transform_4(%arg0: i32) -> (i32, i32) {
    %c0_i32 = arith.constant 0 : i32
    %c0_i32_0 = arith.constant 0 : i32
    %c0_i32_1 = arith.constant 0 : i32
    return %c0_i32, %c0_i32_0 : i32, i32
  }
  func.func @transform_5(%arg0: i32) -> (i32, i32, i32) {
    %c0_i32 = arith.constant 0 : i32
    %c0_i32_0 = arith.constant 0 : i32
    %c0_i32_1 = arith.constant 0 : i32
    return %arg0, %c0_i32, %c0_i32_0 : i32, i32, i32
  }
}

</mosaic_0001>

<bundles_post_ra>
// kernel: tpu_custom_call.1
= control target key start
LH: loop header
LB: loop body
LE: loop exit
PB: predicated region body
PF: predicated region fallthrough
CT: control target
= control target key end

     0   :  { %10 = vsyncpa [#allocation5], 0  ;;  %s1004_s0 = inlined_call_operand.hbm [shape: f32[2,4,4,128], index: 0, kind: input, shape index: {}]   ;;  %s1005_s1 = inlined_call_operand.vmem [shape: f32[8,4], index: 1, kind: input, shape index: {}]   ;;  %s1006_s2 = inlined_call_operand.vmem [shape: f32[8,1], index: 2, kind: input, shape index: {}]   ;;  %s1007_s3 = inlined_call_operand.vmem [shape: f32[8,72], index: 3, kind: input, shape index: {}]   ;;  %s1008_s4 = inlined_call_operand.vmem [shape: f32[8,1], index: 4, kind: input, shape index: {}]   ;;  %s1009_s5 = inlined_call_operand.hbm [shape: f32[2,8,128], index: 5, kind: output, shape index: {}]  }
   0x1   :  { %12 = vsyncpa [#allocation5 + $0x1], 0 }
   0x2   :  { %13 = vsyncpa [#allocation6], 0 }
   0x3   :  { %15 = vsyncpa [#allocation6 + $0x1], 0  ;;  %s848_s18 = smov 0   ;;  %s850_s19 = smov 0  }
   0x4   :  { %s852_s20 = smov 0   ;;  %s854_s21 = smov 0  }
   0x5 LB: > { %s869_s22 = sadd.s32 4294967295, %s804_s21   ;;  %s586_s23 = sadd.s32 4294967294, %s804_s21   ;;  %s804_s21 = sphi %s854_s21, %s1019_s21   ;;  %s800_s20 = sphi %s852_s20, %s1018_s20   ;;  %s796_s19 = sphi %s850_s19, %s1017_s19   ;;  %s792_s18 = sphi %s848_s18, %s1016_s18  }
   0x6   : > { %s873_s24 = sadd.s32 1, %s804_s21   ;;  %s28_s25 = sadd.s32 1, %s800_s20 }
   0x7   : > { %s25_s26 = ssub.s32 %s804_s21, %s873_s24  ;;  %p35_p0 = scmp.ne.s32.totalorder %s800_s20, %s796_s19 }
   0x8   : > { %p26_p1 = scmp.eq.s32.totalorder %s25_s26, 0  ;;  %p36_p2 = scmp.eq.s32.totalorder %s804_s21, 0 }
   0x9   : > { %p41_p3 = scmp.ne.s32.totalorder %s796_s19, %s792_s18  ;;  %p42_p4 = scmp.eq.s32.totalorder %s869_s22, 0 }
   0xa   : > { %s885_s27 = scalar_select %p26_p1, %s800_s20, %s28_s25  }
   0xb   : > { %p887_p5 = por %p36_p2, %p35_p0  ;;  %p891_p6 = por %p42_p4, %p41_p3 }
   0xc   : > { %p149_p7 = scmp.eq.s32.totalorder %s869_s22, 1  ;;  %p155_p8 = scmp.eq.s32.totalorder %s586_s23, 1 }
   0xd   : > { %p616_p10 = scmp.lt.s32.totalorder %s804_s21, 2  ;;  %s187_s7 = sand.u32 1, %s800_s20  }
   0xe   : > { %p898_p11 = por %p149_p7, %p35_p0  ;;  %p902_p12 = por %p155_p8, %p41_p3 }
   0xf   : > { %s603_s8 = sshll.u32 %s804_s21, 4  ;;  %s589_s9 = sshll.u32 %s187_s7, 4 }
  0x10   : > { %s196_s12 = scalar_lea.hbm %s1004_s0, %s603_s8  ;;  %s191_s14 = scalar_lea.vmem [#allocation4], %s589_s9 }
  0x11   : > { %s197_s13 = sshll.u32 %s196_s12, 4  ;;  %s199_s15 = sshll.u32 %s191_s14, 4  ;;  %s198_s13 = int_to_ptr.hbm [resolvable:$true] %s197_s13  ;;  %s200_s15 = int_to_ptr.vmem [resolvable:$true] %s199_s15 }
  0x12   : > { %p913_p13 = pnand %p616_p10, %p887_p5  ;;  %p592_p0 = scmp.ge.s32.totalorder %s804_s21, 1 }
  0x13   : > { %p207_p1 = scmp.lt.s32.totalorder %s804_s21, 3  ;;  %s188_s17 = scalar_lea.sflag [#allocation5], %s187_s7 }
  0x14   : > { %s708_s23 = sshra.s32 %s198_s13, 4  ;;  %p712_p3 = pneg %p913_p13  ;;  %s709_s23 = int_to_ptr.hbm [resolvable:$true] %s708_s23 }
  0x15   : > { %s710_s25 = scalar_lea.hbm %s709_s23, 16  ;;  %s715_s28 = scalar_lea.hbm %s1004_s0, 32 }
  0x16   : > { %p711_p2 = scmp.ne.s32.totalorder %s709_s23, %s710_s25  ;;  %p716_p5 = scmp.lt.s32.totalorder %s709_s23, %s1004_s0 }
  0x17   : > { %p717_p8 = scmp.lt.s32.totalorder %s715_s28, %s710_s25 }
  0x18   : > { %p713_p4 = pnand %p712_p3, %p711_p2 }
  0x19   : > { %p718_p10 = por %p717_p8, %p716_p5 }
  0x1a   : > { %p714_p7 = pneg %p713_p4 }
  0x1c   : > { %p719_p9 = pnand %p718_p10, %p714_p7 }
  0x1e   : > { %722 = shalt.err (!%p719_p9)
}
  0x1f   : > { %s806_s7 = smov 64   ;;  %s807_s11 = smov 4  }
  0x20   : > { %611 = dma.hbm_to_vmem [thread:$0]  (!%p913_p13), %s198_s13, 256, %s200_s15, %s188_s17, %s806_s7, %s806_s7, %s807_s11  }
  0x21   : > { %p208_p2 = pnand %p592_p0, %p207_p1 }
  0x22   : > { %s934_s12 = sand.u32 (!%p208_p2), 1, %s796_s19  }
  0x23   : > { %211 = sbr.rel (%p208_p2) target bundleno = 751 (0x2ef), region = 40  ;;  %s593_s14 = sshll.u32 (!%p208_p2), %s934_s12, 4 }
  0x24   : > { %s214_s23 = scalar_lea.sflag (!%p208_p2), [#allocation5], %s934_s12  ;;  %s217_s25 = scalar_lea.vmem (!%p208_p2), [#allocation4], %s593_s14 }
  0x28   : > { %783 = dma.done.wait (%p891_p6), %s214_s23, 256  }
  0x29   : > { %785 = vsyncadd (%p891_p6), %s214_s23, 4294967040  ;;  %v808_v0 = vmov 0   ;;  %vm262_vm0 = vcmask 1043456   ;;  %v258_v1 = vld [vmem:[%s217_s25] sm:$0xf]  ;;  %vm277_vm1 = vcmask 31744   ;;  %v247_v14 = vlaneseq }
  0x2a   : > { %662 = vset.pattern.permute.xlu0 %v808_v0  ;;  %703 = vset.pattern.permute.xlu1 %v808_v0  ;;  %v259_v2 = vld [vmem:[%s217_s25 + $0x4] sm:$0xf]  ;;  %v260_v3 = vld [vmem:[%s217_s25 + $0x8] sm:$0xf]  ;;  %v261_v4 = vld [vmem:[%s217_s25 + $0xc] sm:$0xf] }
  0x2b   : > { %v263_v5 = vsel %vm262_vm0, %v258_v1, -inf  ;;  %v264_v6 = vsel %vm262_vm0, %v259_v2, -inf  ;;  %v265_v7 = vsel %vm262_vm0, %v260_v3, -inf  ;;  %v266_v8 = vsel %vm262_vm0, %v261_v4, -inf  ;;  %v271_v10 = vld [vmem:[%s1006_s2] sm:$0xff]  ;;  %s810_s17 = smov 112  }
  0x2c   : > { %v267_v9 = vmax.f32 %v263_v5, %v264_v6  ;;  %v268_v11 = vmax.f32 %v265_v7, %v266_v8  ;;  %274 = vperm.xlu0 %662, %v271_v10   ;;  %v270_v13 = vld [vmem:[%s1005_s1] sm:$0xff]  ;;  %v248_v15 = vand.u32 127, %v247_v14  ;;  %v809_v24 = vmov 0.0   ;;  %s811_s26 = smov 111   ;;  %s812_s8 = smov 113  }
  0x2d   : > { %s813_s28 = smov 16   ;;  %s814_s9 = smov 127   ;;  %v441_v53 = vld [vmem:[%s1008_s4] sm:$0xff]  ;;  %vm427_vm7 = vcmask 908288   ;;  %vm415_vm8 = vcmask 916480   ;;  %vm403_vm9 = vcmask 924672  }
  0x2e   : > { %v269_v12 = vmax.f32 %v267_v9, %v268_v11  ;;  %v249_v16 = vcvt.s32.f32 %v248_v15  ;;  %s815_s10 = smov 1   ;;  %s816_s7 = smov 15   ;;  %vm391_vm10 = vcmask 1039360   ;;  %vm377_vm11 = vcmask 7168  }
  0x2f   : > { %s817_s11 = smov 17   ;;  %vm365_vm12 = vcmask 121856   ;;  %vm353_vm13 = vcmask 130048   ;;  %vm341_vm14 = vcmask 138240   ;;  %vm447_vm15 = vcmask 588800   ;;  %s594_s29 = sshll.u32 %s934_s12, 3 }
  0x30   : > { %596 = vmatpush.msk.msra.mxu0 %vm262_vm0, %v269_v12  ;;  %v250_v17 = vadd.f32 0.5, %v249_v16  ;;  %s600_s15 = sshll.u32 %s869_s22, 3  ;;  %s501_s22 = scalar_lea.sflag [#allocation6], %s934_s12 }
  0x31   : > { %597 = vmatmul.msk.f32.vlgmr.msra.gmra.mxu0 %vm277_vm1, %v270_v13  ;;  %s758_s23 = scalar_lea.hbm %s1009_s5, 16 }
  0x32   : > { %v251_v18 = vmul.f32 0.0625, %v250_v17 }
  0x34   : > { %v252_v19 = vfloor.f32 %v251_v18 }
  0x36   : > { %v253_v20 = vmul.f32 16.0, %v252_v19  ;;  %v431_v19 = vld [vmem:[%s1007_s3] sm:$0xff] }
  0x38   : > { %v254_v21 = vsub.f32 %v249_v16, %v253_v20 }
  0x3a   : > { %vm255_vm2 = vcmp.lt.f32.partialorder %v254_v21, 8.0 }
  0x3b   : > { %v953_v25 = vsel %vm255_vm2, 1.0, %v809_v24 }
  0x9e   : > { %v275_v22 = vpop.permute.xlu0 %274 }
  0xae   : > { %v301_v23 = vpop.f32.mrf.mxu0 }
  0xaf   : > { %v302_v26 = vadd.f32 %v301_v23, %v275_v22 }
  0xb1   : > { %v304_v27 = vmul.f32 %v953_v25, %v302_v26 }
  0xb3   : > { %305 = vadd.xlane.f32.xlu0 %v304_v27  ;;  %v307_v28 = vmul.f32 %v304_v27, %v302_v26 }
  0xb5   : > { %308 = vadd.xlane.f32.xlu1 %v307_v28 }
 0x126   : > { %v306_v29 = vpop.xlane.xlu0 %305 }
 0x127   : > { %v310_v30 = vmul.f32 0.015625, %v306_v29 }
 0x128   : > { %v309_v31 = vpop.xlane.xlu1 %308 }
 0x129   : > { %v312_v32 = vmul.f32 %v310_v30, %v310_v30  ;;  %v311_v33 = vmul.f32 0.015625, %v309_v31  ;;  %v315_v43 = vsub.f32 %v302_v26, %v310_v30 }
 0x12b   : > { %v313_v34 = vsub.f32 %v311_v33, %v312_v32 }
 0x12d   : > { %v314_v35 = vmax.f32 %v313_v34, 0.0 }
 0x12f   : > { %v316_v36 = vadd.f32 1e-05, %v314_v35 }
 0x131   : > { %704 = vrsqrt.f32 %v316_v36  ;;  %vm323_vm4 = vweird.f32 %v316_v36 }
 0x137   : > { %v705_v37 = vpop.eup %704 }
 0x138   : > { %v318_v38 = vmul.f32 %v705_v37, %v316_v36  ;;  %vm324_vm3 = vweird.f32 %v705_v37 }
 0x139   : > { %vm325_vm5 = vmor %vm323_vm4, %vm324_vm3 }
 0x13a   : > { %v319_v39 = vmul.f32 %v705_v37, %v318_v38 }
 0x13c   : > { %v320_v40 = vmul.f32 0.5, %v319_v39 }
 0x13e   : > { %v321_v41 = vsub.f32 1.5, %v320_v40 }
 0x140   : > { %v322_v42 = vmul.f32 %v705_v37, %v321_v41 }
 0x142   : > { %v326_v44 = vsel %vm325_vm5, %v705_v37, %v322_v42 }
 0x143   : > { %v327_v45 = vmul.f32 %v326_v44, %v315_v43 }
 0x145   : > { %vm328_vm6 = vcmp.gt.f32.partialorder %v327_v45, 0.0  ;;  %v329_v46 = vmul.f32 0.2, %v327_v45 }
 0x147   : > { %v330_v47 = vsel %vm328_vm6, %v327_v45, %v329_v46 }
 0x148   : > { %v957_v48 = vmul.f32 %v953_v25, %v330_v47 }
 0x14a   : > { %v668_v49 = vpack.i.bf16 0.0, %v957_v48  ;;  %v693_v50 = vpack.i.bf16 %v957_v48, %v809_v24 }
 0x14c   : > { %669 = vrot.lane.b32.xlu2 %v668_v49, %s810_s17  ;;  %664 = vrot.lane.b32.xlu1 %v668_v49, %s811_s26  ;;  %s511_s26 = scalar_lea.hbm %s1009_s5, %s600_s15 }
 0x154   : > { %674 = vrot.lane.b32.xlu2 %v668_v49, %s812_s8  ;;  %694 = vrot.lane.b32.xlu1 %v693_v50, %s813_s28  ;;  %s244_s8 = scalar_lea.vmem [#allocation7], %s594_s29 }
 0x155   : > { %s513_s28 = sshll.u32 %s244_s8, 4  ;;  %s514_s28 = int_to_ptr.vmem [resolvable:$true] %s513_s28 }
 0x15c   : > { %679 = vrot.lane.b32.xlu2 %v668_v49, %s814_s9  ;;  %444 = vperm.xlu1 %703, %v441_v53   ;;  %s515_s9 = sshll.u32 %s511_s26, 4  ;;  %s516_s9 = int_to_ptr.hbm [resolvable:$true] %s515_s9 }
 0x164   : > { %684 = vrot.lane.b32.xlu2 %v693_v50, %s815_s10  ;;  %s752_s10 = sshra.s32 %s516_s9, 4  ;;  %s753_s10 = int_to_ptr.hbm [resolvable:$true] %s752_s10 }
 0x165   : > { %p759_p0 = scmp.lt.s32.totalorder %s753_s10, %s1009_s5 }
 0x16c   : > { %689 = vrot.lane.b32.xlu2 %v693_v50, %s816_s7  ;;  %s754_s7 = scalar_lea.hbm %s753_s10, 8 }
 0x16d   : > { %p755_p6 = scmp.ne.s32.totalorder %s753_s10, %s754_s7  ;;  %p760_p1 = scmp.lt.s32.totalorder %s758_s23, %s754_s7 }
 0x16f   : > { %p756_p9 = pnand %p755_p6, %p898_p11  ;;  %p761_p3 = por %p760_p1, %p759_p0 }
 0x171   : > { %p757_p13 = pneg %p756_p9 }
 0x173   : > { %p762_p4 = pnand %p761_p3, %p757_p13 }
 0x174   : > { %699 = vrot.lane.b32.xlu2 %v693_v50, %s817_s11 }
 0x1a6   : > { %v670_v51 = vpop.permute.xlu2 %669 }
 0x1a7   : > { %v672_v57 = vunpack.i.h.bf16 %v670_v51  ;;  %v671_v58 = vunpack.i.l.bf16 %v670_v51 }
 0x1a9   : > { %v416_v2 = vsel %vm415_vm8, %v671_v58, %v672_v57 }
 0x1ae   : > { %v675_v52 = vpop.permute.xlu2 %674 }
 0x1af   : > { %v677_v61 = vunpack.i.h.bf16 %v675_v52  ;;  %v676_v62 = vunpack.i.l.bf16 %v675_v52 }
 0x1b1   : > { %v404_v3 = vsel %vm403_vm9, %v676_v62, %v677_v61 }
 0x1b6   : > { %v680_v54 = vpop.permute.xlu2 %679 }
 0x1b7   : > { %v682_v0 = vunpack.i.h.bf16 %v680_v54  ;;  %v681_v1 = vunpack.i.l.bf16 %v680_v54 }
 0x1b9   : > { %v392_v7 = vsel %vm391_vm10, %v681_v1, %v682_v0 }
 0x1be   : > { %v685_v55 = vpop.permute.xlu2 %684  ;;  %v665_v56 = vpop.permute.xlu1 %664 }
 0x1bf   : > { %v667_v59 = vunpack.i.h.bf16 %v665_v56  ;;  %v666_v60 = vunpack.i.l.bf16 %v665_v56  ;;  %v687_v5 = vunpack.i.h.bf16 %v685_v55  ;;  %v686_v6 = vunpack.i.l.bf16 %v685_v55 }
 0x1c1   : > { %v428_v63 = vsel %vm427_vm7, %v666_v60, %v667_v59  ;;  %v378_v13 = vsel %vm377_vm11, %v686_v6, %v687_v5 }
 0x1c2   : > { %458 = vmatpush.msra.mxu1 %v428_v63 }
 0x1c4   : > { %459 = vmatpush.msra.mxu1 %v416_v2 }
 0x1c6   : > { %v690_v4 = vpop.permute.xlu2 %689  ;;  %460 = vmatpush.msra.mxu1 %v404_v3  ;;  %v695_v8 = vpop.permute.xlu1 %694 }
 0x1c7   : > { %v692_v9 = vunpack.i.h.bf16 %v690_v4  ;;  %v691_v10 = vunpack.i.l.bf16 %v690_v4  ;;  %v697_v11 = vunpack.i.h.bf16 %v695_v8  ;;  %v696_v12 = vunpack.i.l.bf16 %v695_v8 }
 0x1c8   : > { %461 = vmatpush.msra.mxu1 %v392_v7 }
 0x1c9   : > { %v366_v14 = vsel %vm365_vm12, %v691_v10, %v692_v9  ;;  %v354_v18 = vsel %vm353_vm13, %v696_v12, %v697_v11 }
 0x1ca   : > { %462 = vmatpush.msra.mxu1 %v957_v48 }
 0x1cc   : > { %463 = vmatpush.msra.mxu1 %v378_v13 }
 0x1ce   : > { %v700_v15 = vpop.permute.xlu2 %699  ;;  %464 = vmatpush.msra.mxu1 %v366_v14  ;;  %v445_v21 = vpop.permute.xlu1 %444 }
 0x1cf   : > { %v702_v16 = vunpack.i.h.bf16 %v700_v15  ;;  %v701_v17 = vunpack.i.l.bf16 %v700_v15 }
 0x1d0   : > { %465 = vmatpush.msra.mxu1 %v354_v18 }
 0x1d1   : > { %v342_v20 = vsel %vm341_vm14, %v701_v17, %v702_v16 }
 0x1d2   : > { %466 = vmatpush.msra.mxu1 %v342_v20 }
 0x1d3   : > { %598 = vmatmul.msk.f32.vlgmr.msra.gmra.mxu1 %vm447_vm15, %v431_v19 }
 0x250   : > { %v468_v22 = vpop.f32.mrf.mxu1 }
 0x251   : > { %v469_v23 = vadd.f32 %v468_v22, %v445_v21 }
 0x253   : > { %v471_v24 = vmul.f32 %v953_v25, %v469_v23 }
 0x255   : > { %472 = vadd.xlane.f32.xlu2 %v471_v24  ;;  %v474_v26 = vmul.f32 %v471_v24, %v469_v23 }
 0x257   : > { %475 = vadd.xlane.f32.xlu1 %v474_v26 }
 0x2c8   : > { %v473_v27 = vpop.xlane.xlu2 %472 }
 0x2c9   : > { %v477_v28 = vmul.f32 0.015625, %v473_v27 }
 0x2ca   : > { %v476_v29 = vpop.xlane.xlu1 %475 }
 0x2cb   : > { %v479_v30 = vmul.f32 %v477_v28, %v477_v28  ;;  %v478_v31 = vmul.f32 0.015625, %v476_v29  ;;  %v482_v40 = vsub.f32 %v469_v23, %v477_v28 }
 0x2cd   : > { %v480_v32 = vsub.f32 %v478_v31, %v479_v30 }
 0x2cf   : > { %v481_v33 = vmax.f32 %v480_v32, 0.0 }
 0x2d1   : > { %v483_v34 = vadd.f32 1e-05, %v481_v33 }
 0x2d3   : > { %706 = vrsqrt.f32 %v483_v34  ;;  %vm490_vm1 = vweird.f32 %v483_v34 }
 0x2d9   : > { %v707_v35 = vpop.eup %706 }
 0x2da   : > { %v485_v36 = vmul.f32 %v707_v35, %v483_v34  ;;  %vm491_vm0 = vweird.f32 %v707_v35 }
 0x2db   : > { %vm492_vm2 = vmor %vm490_vm1, %vm491_vm0 }
 0x2dc   : > { %v486_v37 = vmul.f32 %v707_v35, %v485_v36 }
 0x2de   : > { %v487_v38 = vmul.f32 0.5, %v486_v37 }
 0x2e0   : > { %v488_v39 = vsub.f32 1.5, %v487_v38 }
 0x2e2   : > { %v489_v25 = vmul.f32 %v707_v35, %v488_v39 }
 0x2e4   : > { %v493_v41 = vsel %vm492_vm2, %v707_v35, %v489_v25 }
 0x2e5   : > { %v494_v42 = vmul.f32 %v493_v41, %v482_v40 }
 0x2e7   : > { %v495_v43 = vadd.f32 %v494_v42, %v957_v48 }
 0x2e9   : > { %vm496_vm3 = vcmp.gt.f32.partialorder %v495_v43, 0.0  ;;  %v497_v44 = vmul.f32 0.2, %v495_v43 }
 0x2eb   : > { %v498_v45 = vsel %vm496_vm3, %v495_v43, %v497_v44 }
 0x2ec   : > { %499 = vst [vmem:[%s244_s8] sm:$0xff] %v498_v45 }
 0x2ed   : > { %765 = shalt.err (!%p762_p4)
}
 0x2ee   : > { %606 = dma.vmem_to_hbm [thread:$0]  (%p898_p11), %s514_s28, 128, %s516_s9, %s501_s22  }
 0x2ef PF: > { %s527_s12 = sand.u32 1, %s792_s18   ;;  %p1015_p7 = scmp.ge.s32.totalorder %s804_s21, 2 }
 0x2f0   : > { %s528_s29 = scalar_lea.sflag [#allocation6], %s527_s12 }
 0x2f1   : > { %p613_p5 = pnand %p1015_p7, %p902_p12 }
 0x2f3   : > { %p614_p8 = pneg %p613_p5 }
 0x2f5   : > { %787 = dma.done.wait (%p614_p8), %s528_s29, 128  }
 0x2f6   : > { %789 = vsyncadd (%p614_p8), %s528_s29, 4294967168  ;;  %p18_p10 = scmp.ge.s32.totalorder %s873_s24, 4   ;;  %s1016_s18 = smov %s796_s19 }
 0x2f7   : > { %s1017_s19 = smov %s800_s20  ;;  %s1018_s20 = smov %s885_s27 }
 0x2f8   : > { %s1019_s21 = smov %s873_s24  ;;  %20 = sbr.rel (!%p18_p10) target bundleno = 5 (0x5), region = 85 }
 0x2fd   :  { %534 = vsyncpa [#allocation5], 1 }
 0x2fe   :  { %536 = vsyncpa [#allocation5 + $0x1], 1 }
 0x2ff   :  { %537 = vsyncpa [#allocation6], 1 }
 0x300   :  { %539 = vsyncpa [#allocation6 + $0x1], 1 }

</bundles_post_ra>
